<compile_context>
chip_gen: v6e
topology: v6e:2x2x1
jax: 0.10.0
libtpu: 0.0.40
codegen_flags: <defaults>
</compile_context>

<pallas_src>
import jax
import jax.numpy as jnp
import numpy as np
from jax.experimental import pallas as pl
from jax.experimental.pallas import tpu as pltpu

EPS = 1e-5


# ---------------------------------------------------------------------------
# Kernels
# ---------------------------------------------------------------------------
def _conv_stats_kernel(px_ref, w_ref, mu_ref, y_ref, sq_ref):
    """Pass 1: conv tile on the MXU; emit y and accumulate shifted sum-of-squares.

    px_ref : (1, K, THW)  bf16 — transposed im2col patches (pixels on lanes)
    w_ref  : (Co, K)      bf16 — flattened conv weight
    mu_ref : (Co, 1)      f32  — exact per-channel mean of conv(x) (host-side)
    y_ref  : (1, Co, THW) bf16 — conv output tile (lane-dense, NCHW order)
    sq_ref : (1, Co, 1)   f32  — per-batch sum_pixels (y - mu)^2, accumulated over tiles
    """
    @pl.when(pl.program_id(1) == 0)
    def _():
        sq_ref[...] = jnp.zeros_like(sq_ref)

    # conv(x) for this tile, lane-dense: (Co, THW), f32 accumulation on the MXU.
    y = jnp.dot(w_ref[...], px_ref[0], preferred_element_type=jnp.float32)
    y_ref[0] = y.astype(y_ref.dtype)

    d = y - mu_ref[...]                                    # broadcast (Co,1) over lanes
    sq_ref[0] += jnp.sum(d * d, axis=1, keepdims=True)     # (Co, 1)


def _affine_relu_kernel(y_ref, ab_ref, out_ref):
    """Pass 2: out = relu(a * y + b); BN + passport affine pre-folded into (a, b).

    y_ref  : (1, Co, THW) bf16
    ab_ref : (Co, 2)      f32  — [:,0] = scale*inv_std, [:,1] = bias - mean*scale*inv_std
    out_ref: (1, Co, THW) f32  — NCHW-ordered, lane-dense stores
    """
    y = y_ref[0].astype(jnp.float32)
    a = ab_ref[:, 0:1]
    b = ab_ref[:, 1:2]
    out_ref[0] = jnp.maximum(y * a + b, 0.0).astype(out_ref.dtype)


# ---------------------------------------------------------------------------
# Host-side helpers
# ---------------------------------------------------------------------------
def _im2col_t(x, ks, pad):
    """(N, C, H, W) -> (N, C*ks*ks, H*W): transposed im2col (pixels on lanes).

    K ordering is (ci, kh, kw), matching weight.reshape(Co, Ci*ks*ks).
    """
    N, C, H, W = x.shape
    xp = jnp.pad(x, ((0, 0), (0, 0), (pad, pad), (pad, pad)))
    cols = [xp[:, :, i:i + H, j:j + W] for i in range(ks) for j in range(ks)]
    p = jnp.stack(cols, axis=2)                            # (N, C, ks*ks, H, W)
    return p.reshape(N, C * ks * ks, H * W)


def _mean_conv_per_channel(img, weight, ks, pad):
    """Exact mean_{b,h,w} conv(img)_c via linearity of the conv (all f32).

    mean_{b,h,w}(conv(img))_c = sum_{ci,i,j} w[c,ci,i,j] * mean_{b,h,w} img_pad[b,ci,h+i,w+j]
    """
    _, C, H, W = img.shape
    xp = jnp.pad(img.astype(jnp.float32), ((0, 0), (0, 0), (pad, pad), (pad, pad)))
    mbar = jnp.stack(
        [xp[:, :, i:i + H, j:j + W].mean(axis=(0, 2, 3))
         for i in range(ks) for j in range(ks)], axis=-1)  # (C, ks*ks)
    mbar = mbar.reshape(C, ks, ks)
    return jnp.einsum('oikl,ikl->o', weight.astype(jnp.float32), mbar)  # (Co,)


def _vmem_capacity_bytes():
    try:
        return int(pltpu.get_tpu_info().vmem_capacity_bytes)
    except Exception:
        return 64 * 1024 * 1024        # conservative: safe on v5e / v6e / v7x


def _pick_tile_and_vmem(hwp, k, co, cap_lanes=4096):
    """Largest multiple-of-128 divisor of hwp whose double-buffered blocks fit VMEM."""
    capacity = _vmem_capacity_bytes()
    budget = min(int(capacity * 0.55), 64 * 1024 * 1024)

    def footprint(t):
        # pass 1: px + weight + y-out, all counted double-buffered (worst case)
        f1 = 2 * (k * t * 2) + 2 * (co * k * 2) + 2 * (co * t * 2) + 8 * co * 4
        # pass 2: y-in (bf16) + out (f32)
        f2 = 2 * (co * t * 2) + 2 * (co * t * 4) + 8 * co * 4
        return max(f1, f2)

    best = 128
    t = 128
    while t <= min(hwp, cap_lanes):
        if hwp % t == 0 and footprint(t) <= budget:
            best = t
        t += 128

    limit = int(min(max(footprint(best) + (8 << 20), 32 << 20), capacity - (8 << 20)))
    return best, limit


# ---------------------------------------------------------------------------
# Forward wrapper
# ---------------------------------------------------------------------------
def passport_block_forward(x, weight, key, skey, ks=3, pad=1):
    """x: (N, Ci, H, W) f32.  weight: (Co, Ci, ks, ks) f32.  key/skey: (1, Ci, H, W) f32."""
    N, Ci, H, W = x.shape
    Co = weight.shape[0]
    K = Ci * ks * ks
    HW = H * W
    M = N * HW

    # Passport scale / bias and the exact conv mean — all via linearity, no extra matmuls.
    scale = _mean_conv_per_channel(skey, weight, ks, pad)          # (Co,)
    bias = _mean_conv_per_channel(key, weight, ks, pad)            # (Co,)
    mu = _mean_conv_per_channel(x, weight, ks, pad)                # (Co,) exact mean of conv(x)
    # TODO(synk): SignLoss loss/acc accumulation on buffer `b` is a training-time side
    # effect on module state and does not affect the forward output.

    # Transposed im2col (pixels on lanes), bf16 MXU operand; pad the pixel axis to a
    # multiple of 128 so all kernel stores are unmasked / lane-dense.
    # TODO(synk): replace the host-side im2col (9x activation HBM amplification, now
    # read once) with an in-kernel halo'd-slab conv (manual DMA) in a future revision.
    px = _im2col_t(x.astype(jnp.bfloat16), ks, pad)                # (N, K, HW)
    HWp = ((HW + 127) // 128) * 128
    if HWp != HW:
        px = jnp.pad(px, ((0, 0), (0, 0), (0, HWp - HW)))
    w2 = weight.reshape(Co, K).astype(jnp.bfloat16)                # (Co, K)
    mu_col = mu.astype(jnp.float32)[:, None]                       # (Co, 1)

    thw, vmem_limit = _pick_tile_and_vmem(HWp, K, Co)
    grid = (N, HWp // thw)

    px_spec = pl.BlockSpec((1, K, thw), lambda n, t: (n, 0, t))
    # TODO(synk): mark w_spec / ab_spec with pipeline_mode=pl.Buffered(1) (constant index
    # maps) once single-buffered pipeline_mode is verified on the target jax build.
    w_spec = pl.BlockSpec((Co, K), lambda n, t: (0, 0))
    mu_spec = pl.BlockSpec((Co, 1), lambda n, t: (0, 0))
    y_spec = pl.BlockSpec((1, Co, thw), lambda n, t: (n, 0, t))
    sq_spec = pl.BlockSpec((1, Co, 1), lambda n, t: (n, 0, 0))

    # --- pass 1: conv (bf16 MXU, f32 acc) -> emit y + per-batch shifted sum-of-squares ---
    flops1 = 2 * N * HWp * Co * K + 3 * N * HWp * Co
    bytes1 = (px.size * 2 + w2.size * 2 + mu_col.size * 4
              + N * Co * HWp * 2 + N * Co * 4)
    y, sq = pl.pallas_call(
        _conv_stats_kernel,
        out_shape=(jax.ShapeDtypeStruct((N, Co, HWp), jnp.bfloat16),
                   jax.ShapeDtypeStruct((N, Co, 1), jnp.float32)),
        grid=grid,
        in_specs=[px_spec, w_spec, mu_spec],
        out_specs=(y_spec, sq_spec),
        compiler_params=pltpu.CompilerParams(
            dimension_semantics=("parallel", "arbitrary"),
            vmem_limit_bytes=vmem_limit),
        cost_estimate=pl.CostEstimate(flops=int(flops1), transcendentals=0,
                                      bytes_accessed=int(bytes1)),
    )(px, w2, mu_col)

    # --- fold BN (biased batch stats) + passport affine into per-channel (a, b) ---
    sumsq = jnp.sum(sq[:, :, 0], axis=0)                           # (Co,)
    # zero-padded pixel columns produced y == 0 exactly -> each added mu^2; remove exactly.
    sumsq = sumsq - float(N * (HWp - HW)) * mu * mu
    var = sumsq / float(M)
    inv_std = jax.lax.rsqrt(var + EPS)
    a = scale * inv_std
    b = bias - mu * a
    ab = jnp.stack([a, b], axis=1).astype(jnp.float32)             # (Co, 2)
    ab_spec = pl.BlockSpec((Co, 2), lambda n, t: (0, 0))

    # --- pass 2: out = relu(a*y + b), fully parallel over (batch, pixel tiles) ---
    flops2 = 3 * N * HWp * Co
    bytes2 = N * Co * HWp * 2 + Co * 2 * 4 + N * Co * HWp * 4
    out_flat = pl.pallas_call(
        _affine_relu_kernel,
        out_shape=jax.ShapeDtypeStruct((N, Co, HWp), jnp.float32),
        grid=grid,
        in_specs=[y_spec, ab_spec],
        out_specs=pl.BlockSpec((1, Co, thw), lambda n, t: (n, 0, t)),
        compiler_params=pltpu.CompilerParams(
            dimension_semantics=("parallel", "parallel"),
            vmem_limit_bytes=vmem_limit),
        cost_estimate=pl.CostEstimate(flops=int(flops2), transcendentals=0,
                                      bytes_accessed=int(bytes2)),
    )(y, ab)

    if HWp != HW:
        out_flat = out_flat[:, :, :HW]
    return out_flat.reshape(N, Co, H, W)                           # already NCHW-ordered


# ---------------------------------------------------------------------------
# Pure-JAX reference (PyTorch training-mode semantics)
# ---------------------------------------------------------------------------
def reference_forward(x, weight, key, skey, ks=3, pad=1):
    def conv(inp):
        return jax.lax.conv_general_dilated(
            inp, weight, window_strides=(1, 1),
            padding=[(pad, pad), (pad, pad)],
            dimension_numbers=("NCHW", "OIHW", "NCHW"))

    y = conv(x)
    mean = y.mean(axis=(0, 2, 3), keepdims=True)
    var = ((y - mean) ** 2).mean(axis=(0, 2, 3), keepdims=True)
    y_hat = (y - mean) / jnp.sqrt(var + EPS)
    scale = conv(skey).mean(axis=(0, 2, 3)).reshape(1, -1, 1, 1)
    bias = conv(key).mean(axis=(0, 2, 3)).reshape(1, -1, 1, 1)
    return jnp.maximum(scale * y_hat + bias, 0.0)


if __name__ == "__main__":
    # Small shapes consistent with the module: Conv2d(Ci=4, Co=8, ks=3, s=1, pd=1)
    N, Ci, Co, H, W, ks, pad = 2, 4, 8, 16, 16, 3, 1

    root = jax.random.PRNGKey(0)
    k_x, k_w, k_key, k_skey = jax.random.split(root, 4)

    x = jax.random.normal(k_x, (N, Ci, H, W), dtype=jnp.float32)

    # conv weight: kaiming_normal_(mode='fan_out', nonlinearity='relu')
    fan_out = Co * ks * ks
    std = float(np.sqrt(2.0 / fan_out))
    weight = std * jax.random.normal(k_w, (Co, Ci, ks, ks), dtype=jnp.float32)

    # passport key / skey: uniform(-1, 1), batch dim forced to 1 (generate_key)
    key = jax.random.uniform(k_key, (1, Ci, H, W), minval=-1.0, maxval=1.0,
                             dtype=jnp.float32)
    skey = jax.random.uniform(k_skey, (1, Ci, H, W), minval=-1.0, maxval=1.0,
                              dtype=jnp.float32)

    out = jax.block_until_ready(
        passport_block_forward(x, weight, key, skey, ks=ks, pad=pad))
    ref = jax.block_until_ready(
        reference_forward(x, weight, key, skey, ks=ks, pad=pad))
    np.testing.assert_allclose(np.asarray(out), np.asarray(ref),
                               rtol=2e-2, atol=2e-2)

    print("KERNEL_OK")
</pallas_src>

<mosaic_0001>
module attributes {stable_mosaic.version = 11 : i64} {
  func.func @_conv_stats_kernel(%arg0: i32, %arg1: i32, %arg2: memref<1x36x256xbf16, #tpu.memory_space<vmem>>, %arg3: memref<8x36xbf16, #tpu.memory_space<vmem>>, %arg4: memref<8x1xf32, #tpu.memory_space<vmem>>, %arg5: memref<1x8x256xbf16, #tpu.memory_space<vmem>>, %arg6: memref<1x8x1xf32, #tpu.memory_space<vmem>>) attributes {dimension_semantics = [#tpu.dimension_semantics<parallel>, #tpu.dimension_semantics<arbitrary>], iteration_bounds = array<i64: 2, 1>, scalar_prefetch = 0 : i64, scratch_operands = 0 : i64, tpu.core_type = #tpu.core_type<tc>, window_params = [{transform_indices = @transform_0, window_bounds = array<i64: 1, 36, 256>}, {pipeline_mode = #tpu.pipeline_mode<synchronous>, transform_indices = @transform_1, window_bounds = array<i64: 8, 36>}, {pipeline_mode = #tpu.pipeline_mode<synchronous>, transform_indices = @transform_2, window_bounds = array<i64: 8, 1>}, {transform_indices = @transform_3, window_bounds = array<i64: 1, 8, 256>}, {transform_indices = @transform_4, window_bounds = array<i64: 1, 8, 1>}]} {
    %c0_i32 = arith.constant 0 : i32
    %0 = arith.cmpi eq, %arg1, %c0_i32 : i32
    %1 = arith.extui %0 : i1 to i32
    %c0_i32_0 = arith.constant 0 : i32
    %2 = arith.cmpi ne, %1, %c0_i32_0 : i32
    scf.if %2 {
      %cst_17 = arith.constant 0.000000e+00 : f32
      %23 = vector.broadcast %cst_17 : f32 to vector<1x8x1xf32>
      %c0_18 = arith.constant 0 : index
      %c0_19 = arith.constant 0 : index
      %c0_20 = arith.constant 0 : index
      %24 = vector.load %arg6[%c0_18, %c0_19, %c0_20] : memref<1x8x1xf32, #tpu.memory_space<vmem>>, vector<1x8x1xf32>
      tpu.vector_store %arg6[%c0_18, %c0_19, %c0_20], %23 {strides = array<i32>} : memref<1x8x1xf32, #tpu.memory_space<vmem>>, vector<1x8x1xf32>,
    } else {
    }
    %c0 = arith.constant 0 : index
    %c0_1 = arith.constant 0 : index
    %3 = vector.load %arg3[%c0, %c0_1] : memref<8x36xbf16, #tpu.memory_space<vmem>>, vector<8x36xbf16>
    %c0_2 = arith.constant 0 : index
    %c0_3 = arith.constant 0 : index
    %c0_4 = arith.constant 0 : index
    %4 = vector.load %arg2[%c0_2, %c0_3, %c0_4] : memref<1x36x256xbf16, #tpu.memory_space<vmem>>, vector<1x36x256xbf16>
    %5 = vector.shape_cast %4 : vector<1x36x256xbf16> to vector<36x256xbf16>
    %cst = arith.constant dense<0.000000e+00> : vector<8x256xf32>
    %6 = tpu.matmul %3, %5, %cst {dimension_numbers = #tpu.dot_dimension_numbers<[1], [0], [0], [1], [0, 0, 1, 1], [], []>} : vector<8x36xbf16>, vector<36x256xbf16>, vector<8x256xf32> -> vector<8x256xf32>
    %7 = arith.truncf %6 : vector<8x256xf32> to vector<8x256xbf16>
    %c0_5 = arith.constant 0 : index
    %c0_6 = arith.constant 0 : index
    %c0_7 = arith.constant 0 : index
    %8 = vector.load %arg5[%c0_5, %c0_6, %c0_7] : memref<1x8x256xbf16, #tpu.memory_space<vmem>>, vector<1x8x256xbf16>
    %9 = vector.shape_cast %8 : vector<1x8x256xbf16> to vector<8x256xbf16>
    %10 = vector.shape_cast %7 : vector<8x256xbf16> to vector<1x8x256xbf16>
    tpu.vector_store %arg5[%c0_5, %c0_6, %c0_7], %10 {strides = array<i32>} : memref<1x8x256xbf16, #tpu.memory_space<vmem>>, vector<1x8x256xbf16>,
    %c0_8 = arith.constant 0 : index
    %c0_9 = arith.constant 0 : index
    %11 = vector.load %arg4[%c0_8, %c0_9] : memref<8x1xf32, #tpu.memory_space<vmem>>, vector<8x1xf32>
    %12 = vector.broadcast %11 : vector<8x1xf32> to vector<8x256xf32>
    %13 = arith.subf %6, %12 : vector<8x256xf32>
    %c0_10 = arith.constant 0 : index
    %c0_11 = arith.constant 0 : index
    %c0_12 = arith.constant 0 : index
    %14 = vector.load %arg6[%c0_10, %c0_11, %c0_12] : memref<1x8x1xf32, #tpu.memory_space<vmem>>, vector<1x8x1xf32>
    %15 = vector.shape_cast %14 : vector<1x8x1xf32> to vector<8x1xf32>
    %16 = arith.mulf %13, %13 : vector<8x256xf32>
    %cst_13 = arith.constant dense<0.000000e+00> : vector<8xf32>
    %17 = vector.multi_reduction <add>, %16, %cst_13 [1] : vector<8x256xf32> to vector<8xf32>
    %18 = vector.shape_cast %17 : vector<8xf32> to vector<8x1xf32>
    %19 = arith.addf %15, %18 : vector<8x1xf32>
    %c0_14 = arith.constant 0 : index
    %c0_15 = arith.constant 0 : index
    %c0_16 = arith.constant 0 : index
    %20 = vector.load %arg6[%c0_14, %c0_15, %c0_16] : memref<1x8x1xf32, #tpu.memory_space<vmem>>, vector<1x8x1xf32>
    %21 = vector.shape_cast %20 : vector<1x8x1xf32> to vector<8x1xf32>
    %22 = vector.shape_cast %19 : vector<8x1xf32> to vector<1x8x1xf32>
    tpu.vector_store %arg6[%c0_14, %c0_15, %c0_16], %22 {strides = array<i32>} : memref<1x8x1xf32, #tpu.memory_space<vmem>>, vector<1x8x1xf32>,
    return
  }
  func.func @transform_0(%arg0: i32, %arg1: i32) -> (i32, i32, i32) {
    %c0_i32 = arith.constant 0 : i32
    %c0_i32_0 = arith.constant 0 : i32
    return %arg0, %c0_i32, %arg1 : i32, i32, i32
  }
  func.func @transform_1(%arg0: i32, %arg1: i32) -> (i32, i32) {
    %c0_i32 = arith.constant 0 : i32
    %c0_i32_0 = arith.constant 0 : i32
    %c0_i32_1 = arith.constant 0 : i32
    return %c0_i32, %c0_i32_0 : i32, i32
  }
  func.func @transform_2(%arg0: i32, %arg1: i32) -> (i32, i32) {
    %c0_i32 = arith.constant 0 : i32
    %c0_i32_0 = arith.constant 0 : i32
    %c0_i32_1 = arith.constant 0 : i32
    return %c0_i32, %c0_i32_0 : i32, i32
  }
  func.func @transform_3(%arg0: i32, %arg1: i32) -> (i32, i32, i32) {
    %c0_i32 = arith.constant 0 : i32
    %c0_i32_0 = arith.constant 0 : i32
    return %arg0, %c0_i32, %arg1 : i32, i32, i32
  }
  func.func @transform_4(%arg0: i32, %arg1: i32) -> (i32, i32, i32) {
    %c0_i32 = arith.constant 0 : i32
    %c0_i32_0 = arith.constant 0 : i32
    %c0_i32_1 = arith.constant 0 : i32
    return %arg0, %c0_i32, %c0_i32_0 : i32, i32, i32
  }
}

</mosaic_0001>

<bundles_post_ra>
// kernel: tpu_custom_call.1
= control target key start
LH: loop header
LB: loop body
LE: loop exit
PB: predicated region body
PF: predicated region fallthrough
CT: control target
= control target key end

     0   :  { %10 = vsyncpa [#allocation3], 0  ;;  %s790_s0 = inlined_call_operand.vmem [shape: bf16[2,36,256], index: 0, kind: input, shape index: {}]   ;;  %s791_s1 = inlined_call_operand.vmem [shape: bf16[8,36], index: 1, kind: input, shape index: {}]   ;;  %s792_s2 = inlined_call_operand.vmem [shape: f32[8,1], index: 2, kind: input, shape index: {}]   ;;  %s793_s3 = inlined_call_operand.hbm [shape: bf16[2,8,256], index: 3, kind: output, shape index: {0}]   ;;  %s794_s4 = inlined_call_operand.vmem [shape: f32[2,8,1], index: 4, kind: output, shape index: {1}]  }
   0x1   :  { %12 = vsyncpa [#allocation3 + $0x1], 0  ;;  %s675_s15 = smov 0   ;;  %s677_s16 = smov 0  }
   0x2   :  { %s679_s17 = smov 0   ;;  %s681_s18 = smov 0  }
   0x3   :  { %s683_s19 = smov 0   ;;  %s685_s20 = smov 0  }
   0x4 LB: > { %s478_s21 = sadd.s32 4294967295, %s645_s20   ;;  %s479_s22 = sadd.s32 4294967294, %s645_s20   ;;  %s645_s20 = sphi %s685_s20, %s18_s20   ;;  %s641_s19 = sphi %s683_s19, %s801_s19   ;;  %s637_s18 = sphi %s681_s18, %s800_s18   ;;  %s633_s17 = sphi %s679_s17, %s799_s17   ;;  %s629_s16 = sphi %s677_s16, %s798_s16   ;;  %s625_s15 = sphi %s675_s15, %s797_s15  }
   0x5   : > { %s30_s23 = sadd.s32 1, %s641_s19  ;;  %s109_s24 = sadd.s32 1, %s633_s17 }
   0x6   : > { %p32_p0 = scmp.ge.s32.totalorder %s30_s23, 2  ;;  %p119_p1 = scmp.ne.s32.totalorder %s633_s17, %s629_s16 }
   0x7   : > { %p120_p2 = scmp.eq.s32.totalorder %s478_s21, 1  ;;  %p125_p3 = scmp.ne.s32.totalorder %s629_s16, %s625_s15 }
   0x8   : > { %s803_s23 = smov (%p32_p0, %s30_s23), 0  ;;  %p126_p5 = scmp.eq.s32.totalorder %s479_s22, 1 }
   0x9   : > { %p715_p4 = por %p120_p2, %p119_p1  ;;  %s104_s26 = ssub.s32 %s641_s19, %s803_s23 }
   0xa   : > { %p482_p6 = scmp.ge.s32.totalorder %s645_s20, 1  ;;  %p107_p7 = scmp.eq.s32.totalorder %s104_s26, 0 }
   0xb   : > { %p722_p8 = por %p126_p5, %p125_p3  ;;  %p189_p9 = scmp.lt.s32.totalorder %s645_s20, 3 }
   0xc   : > { %s728_s28 = scalar_select %p107_p7, %s633_s17, %s109_s24  }
   0xd   : > { %p190_p10 = pnand %p482_p6, %p189_p9 }
   0xe   : > { %p224_p11 = scmp.lt.s32.totalorder (!%p190_p10), %s637_s18, 1  ;;  %s214_s22 = sand.u32 (!%p190_p10), 1, %s629_s16  }
   0xf   : > { %193 = sbr.rel (%p190_p10) target bundleno = 382 (0x17e), region = 32  ;;  %s483_s24 = sshll.u32 (!%p190_p10), %s214_s22, 3 }
  0x10   : > { %s216_s26 = scalar_lea.vmem (!%p190_p10), [#allocation2], %s483_s24  ;;  %s501_s29 = sshll.u32 (!%p190_p10), %s637_s18, 7 }
  0x11   : > { %s375_s30 = sshll.u32 (!%p190_p10), %s216_s26, 4  ;;  %s373_s7 = scalar_lea.hbm (!%p190_p10), %s793_s3, %s501_s29  ;;  %s376_s30 = int_to_ptr.vmem [resolvable:$true] %s375_s30 }
  0x12   : > { %s355_s8 = scalar_lea.sflag (!%p190_p10), [#allocation3], %s214_s22  ;;  %s649_s10 = smov (!%p190_p10), [#allocation2]  }
  0x13   : > { %s573_s11 = sshll.u32 (!%p190_p10), %s649_s10, 4  ;;  %s574_s11 = int_to_ptr.vmem [resolvable:$false] %s573_s11 }
  0x14   : > { %v647_v0 = vmov 0   ;;  %v337_v1 = vld [vmem:[%s792_s2] sm:$0xff]  ;;  %s225_s5 = scalar_select %p224_p11, %s637_s18, 1  ;;  %vm280_vm0 = vcmask 1041408   ;;  %vm276_vm1 = vcmask 293888   ;;  %vm243_vm2 = vcmask 7168  }
  0x15   : > { %319 = vmatprep.mubr.bf16.mxu0 %v647_v0  ;;  %560 = vset.pattern.permute.xlu0 %v647_v0  ;;  %v245_v10 = vld [vmem:[%s791_s1] sm:$0xf]  ;;  %v648_v11 = vmov 0.0   ;;  %p576_p1 = scmp.lt.s32.totalorder %s376_s30, %s574_s11 }
  0x16   : > { %340 = vperm.xlu0 %560, %v337_v1   ;;  %s502_s6 = smul.u32 40, %s225_s5  ;;  %s485_s12 = sshll.u32 %s225_s5, 3 }
  0x17   : > { %s744_s21 = scalar_lea.vmem %s794_s4, %s485_s12  ;;  %s575_s12 = scalar_lea.vmem %s574_s11, 256 }
  0x18   : > { %s231_s9 = scalar_lea.vmem %s790_s0, %s502_s6  ;;  %244 = vst.msk [vmem:[%s744_s21] sm:$0xff] %vm243_vm2, %v648_v11 }
  0x19   : > { %v250_v2 = vld [vmem:[%s231_s9 + $0x20] sm:$0x33]  ;;  %v563_v5 = vld [vmem:[%s231_s9 + $0x14] ss:$8 sps:$4 sm:$0xff]   ;;  %v565_v7 = vld [vmem:[%s231_s9 + $0x10] ss:$8 sps:$4 sm:$0xff]  }
  0x1a   : > { %v491_v3 = vcombine.high %v250_v2, %v250_v2  ;;  %v490_v4 = vcombine.low %v250_v2, %v250_v2  ;;  %v566_v8 = vld [vmem:[%s231_s9 + $0x4] ss:$8 sps:$4 sm:$0xff]   ;;  %v568_v9 = vld [vmem:[%s231_s9] ss:$8 sps:$4 sm:$0xff]   ;;  %s569_s9 = scalar_lea.vmem %s376_s30, 128 }
  0x1b   : > { %p570_p12 = scmp.ne.s32.totalorder %s376_s30, %s569_s9  ;;  %p577_p2 = scmp.lt.s32.totalorder %s575_s12, %s569_s9 }
  0x1c   : > { %492 = vmatprep.subr.msk.bf16.mxu0 %vm280_vm0, %v491_v3  ;;  %v282_v6 = vsel %vm280_vm0, %v490_v4, 0 }
  0x1d   : > { %298 = vmatpush1.bf16.msra.mxu0 %v282_v6  ;;  %p571_p13 = pnand %p570_p12, %p715_p4  ;;  %p578_p3 = por %p577_p2, %p576_p1 }
  0x1e   : > { %299 = vmatprep.subr.bf16.mxu0 %v563_v5 }
  0x1f   : > { %p572_p0 = pneg %p571_p13 }
  0x21   : > { %300 = vmatpush1.bf16.msra.mxu0 %v565_v7  ;;  %p579_p5 = pnand %p578_p3, %p572_p0 }
  0x22   : > { %301 = vmatprep.subr.bf16.mxu0 %v566_v8 }
  0x25   : > { %302 = vmatpush1.bf16.msra.mxu0 %v568_v9 }
  0x28   : > { %493 = vmatmul.mubr.msk.bf16.vlgmr.msra.gmra.mxu0 %vm276_vm1, %v245_v10 }
  0x91   : > { %v341_v12 = vpop.permute.xlu0 %340 }
  0xe8   : > { %v321_v13 = vpop.f32.mrf.mxu0 }
  0xe9   : > { %v343_v14 = vsub.f32 %v321_v13, %v341_v12 }
  0xea   : > { %v323_v15 = vpop.f32.mrf.mxu0 }
  0xeb   : > { %v500_v16 = vpack.c.bf16 %v323_v15, %v321_v13  ;;  %v344_v17 = vsub.f32 %v323_v15, %v341_v12  ;;  %v346_v19 = vmul.f32 %v343_v14, %v343_v14 }
  0xec   : > { %v325_v18 = vpop.f32.mrf.mxu0 }
  0xed   : > { %v347_v20 = vmul.f32 %v344_v17, %v344_v17  ;;  %336 = vst [vmem:[%s216_s26] sm:$0xff] %v500_v16 }
  0xee   : > { %v326_v21 = vpop.f32.mrf.mxu0 }
  0xef   : > { %v348_v22 = vadd.f32 %v347_v20, %v346_v19 }
  0xf1   : > { %349 = vadd.xlane.f32.xlu0 %v348_v22 }
  0xf2   : > { %582 = shalt.err (!%p579_p5)
}
  0xf3   : > { %s583_s18 = scalar_lea.hbm %s373_s7, 128  ;;  %s587_s22 = scalar_lea.hbm %s793_s3, 256 }
  0xf4   : > { %p584_p6 = scmp.ne.s32.totalorder %s373_s7, %s583_s18  ;;  %p588_p10 = scmp.lt.s32.totalorder %s373_s7, %s793_s3 }
  0xf5   : > { %p589_p11 = scmp.lt.s32.totalorder %s587_s22, %s583_s18 }
  0xf6   : > { %p585_p7 = pnand %p584_p6, %p715_p4 }
  0xf7   : > { %p590_p12 = por %p589_p11, %p588_p10 }
  0xf8   : > { %p586_p9 = pneg %p585_p7 }
  0xfa   : > { %p591_p13 = pnand %p590_p12, %p586_p9 }
  0xfc   : > { %594 = shalt.err (!%p591_p13)
}
  0xfd   : > { %503 = dma.vmem_to_hbm [thread:$0]  (%p715_p4), %s376_s30, 128, %s373_s7, %s355_s8   ;;  %v345_v23 = vld [vmem:[%s744_s21] sm:$0xff] }
 0x17a   : > { %v350_v24 = vpop.xlane.xlu0 %349 }
 0x17b   : > { %v351_v25 = vadd.f32 %v350_v24, %v345_v23 }
 0x17d   : > { %353 = vst.msk [vmem:[%s744_s21] sm:$0xff] %vm243_vm2, %v351_v25 }
 0x17e PF: > { %p509_p0 = scmp.ge.s32.totalorder %s645_s20, 2  ;;  %s390_s29 = sand.u32 1, %s625_s15  }
 0x17f   : > { %s391_s5 = scalar_lea.sflag [#allocation3], %s390_s29 }
 0x180   : > { %p506_p1 = pnand %p509_p0, %p722_p8 }
 0x182   : > { %p507_p2 = pneg %p506_p1 }
 0x184   : > { %620 = dma.done.wait (%p507_p2), %s391_s5, 128  }
 0x185   : > { %622 = vsyncadd (%p507_p2), %s391_s5, 4294967168  ;;  %s18_s20 = sadd.s32 1, %s645_s20   ;;  %s797_s15 = smov %s629_s16 }
 0x186   : > { %p15_p4 = scmp.ge.s32.totalorder %s18_s20, 4   ;;  %s798_s16 = smov %s633_s17 }
 0x187   : > { %s799_s17 = smov %s728_s28  ;;  %s800_s18 = smov %s641_s19 }
 0x188   : > { %s801_s19 = smov %s803_s23  ;;  %17 = sbr.rel (!%p15_p4) target bundleno = 4 (0x4), region = 83 }
 0x18d   :  { %403 = vsyncpa [#allocation3], 1 }
 0x18e   :  { %405 = vsyncpa [#allocation3 + $0x1], 1 }

</bundles_post_ra>
